<compile_context>
chip_gen: v7x
topology: tpu7x:2x2x1
jax: 0.10.0
libtpu: 0.0.40
codegen_flags: <defaults>
</compile_context>

<pallas_src>
import jax
import jax.numpy as jnp
from jax import lax
from jax.experimental import pallas as pl
from jax.experimental.pallas import tpu as pltpu


def _round_up(x, m):
    return (x + m - 1) // m * m


def _partition_uniform(num_items, num_parts):
    """Mirror deepspeed.runtime.utils.partition_uniform (floor chunks, residual last)."""
    parts = [0] * (num_parts + 1)
    if num_items <= num_parts:
        for p in range(num_parts + 1):
            parts[p] = min(p, num_items)
        return parts
    chunksize = num_items // num_parts
    for p in range(num_parts):
        parts[p] = min(chunksize * p, num_items)
    parts[num_parts] = num_items
    return parts


# ----------------------------- kernels ------------------------------------


def _tiled_linear_kernel_f32(x_ref, w_ref, b_ref, o_ref):
    # grid = (M//tm, N//tn, K//tk); reduction axis K is last ("arbitrary").
    # Output block index_map ignores k -> it stays resident in VMEM across the
    # whole reduction, so we accumulate straight into it (f32 output).
    k = pl.program_id(2)

    @pl.when(k == 0)
    def _():
        o_ref[...] = jnp.zeros_like(o_ref)

    # x tile: (tm, tk); weight tile: (tn, tk) in native Linear layout.
    # Contract the K dims directly (x @ W.T) on the MXU.
    o_ref[...] += lax.dot_general(
        x_ref[...], w_ref[...],
        dimension_numbers=(((1,), (1,)), ((), ())),
        preferred_element_type=jnp.float32,
    )

    @pl.when(k == pl.num_programs(2) - 1)
    def _():
        # Bias added exactly once per output tile — matches TiledLinear adding
        # local_bias only on the last in_id.
        o_ref[...] += b_ref[...]


def _tiled_linear_kernel_acc(x_ref, w_ref, b_ref, o_ref, acc_ref):
    # Variant with an explicit f32 accumulator for non-f32 outputs (bf16, ...).
    k = pl.program_id(2)

    @pl.when(k == 0)
    def _():
        acc_ref[...] = jnp.zeros_like(acc_ref)

    acc_ref[...] += lax.dot_general(
        x_ref[...], w_ref[...],
        dimension_numbers=(((1,), (1,)), ((), ())),
        preferred_element_type=jnp.float32,
    )

    @pl.when(k == pl.num_programs(2) - 1)
    def _():
        o_ref[...] = (acc_ref[...] + b_ref[...]).astype(o_ref.dtype)


# --------------------------- tiling heuristics -----------------------------


def _tpu_generation():
    try:
        kind = jax.devices()[0].device_kind.lower()
    except Exception:
        return "unknown"
    if "v5e" in kind or "v5 lite" in kind or "v5lite" in kind or "v5litepod" in kind:
        return "v5e"
    if "v6" in kind:
        return "v6e"
    if "v7" in kind or "7x" in kind:
        return "v7x"
    return "unknown"


def _vmem_capacity_bytes(generation):
    try:
        info = pltpu.get_tpu_info()
        cap = int(getattr(info, "vmem_capacity_bytes", 0))
        if cap > 0:
            return cap
    except Exception:
        pass
    # Conservative fallback: v7x has 64 MiB/TC, v5e/v6e have 128 MiB.
    return (64 << 20) if generation in ("v7x", "unknown") else (128 << 20)


def _pick_tile(dim, target, align):
    """Largest tile <= target, multiple of `align`, preferring exact divisors
    of the align-padded dim so no wrapper-side padding is needed."""
    aligned = _round_up(max(int(dim), 1), align)
    target = max(align, (int(target) // align) * align)
    if aligned <= target:
        return aligned
    t = target
    best = align
    while t >= align:
        if aligned % t == 0:
            best = t
            break
        t -= align
    if best * 2 >= target:   # divisor large enough -> avoid padding entirely
        return best
    return target            # pad rather than cripple arithmetic intensity


# ------------------------------- wrapper -----------------------------------


def tiled_linear(x, weight, bias=None, *, in_splits=1, out_splits=1,
                 input_is_already_split=False, combine_out_splits=True,
                 tile_m=None, tile_n=None, tile_k=None, compute_dtype=None):
    """Forward of TiledLinear.

    x:      (..., in_features), or a list of `in_splits` chunks if
            input_is_already_split=True
    weight: (out_features, in_features)   -- PyTorch Linear layout, NOT transposed
    bias:   (out_features,) or None

    in_splits / out_splits control API fidelity with the PyTorch module; the
    combined result is independent of them (partial products are summed and
    bias is added once), so the kernel uses hardware-sized tiles instead.
    compute_dtype (e.g. jnp.bfloat16) optionally casts operands for MXU peak
    while keeping f32 accumulation and the original output dtype.
    """
    if input_is_already_split and in_splits > 1:
        assert isinstance(x, (list, tuple)) and len(x) == in_splits, (
            f"Col splits {in_splits} does not match input splits")
        x = jnp.concatenate(list(x), axis=-1)

    in_features = x.shape[-1]
    out_features = weight.shape[0]
    assert weight.shape == (out_features, in_features)
    if not (1 <= in_splits <= in_features):
        raise RuntimeError("in splits must be in range [1, in_features].")
    if not (1 <= out_splits <= out_features):
        raise RuntimeError("out splits must be in range [1, out_features].")

    lead = x.shape[:-1]
    out_dtype = x.dtype
    x2d = x.reshape(-1, in_features)
    B, K, N = x2d.shape[0], in_features, out_features

    gen = _tpu_generation()
    vmem_cap = _vmem_capacity_bytes(gen)

    if compute_dtype is not None:
        x2d = x2d.astype(compute_dtype)
        weight = weight.astype(compute_dtype)
    op_itemsize = max(jnp.dtype(x2d.dtype).itemsize, jnp.dtype(weight.dtype).itemsize)

    # Generation-aware tile targets. Arithmetic intensity of one (m,n,k) step
    # is 2*tm*tn/((tm+tn)*itemsize): tk does not change HBM traffic, so the
    # VMEM budget goes into tm/tn and tk stays at 512.
    if gen == "v6e":
        mn_target = 2048 if op_itemsize <= 2 else 1024
    elif gen == "v5e":
        mn_target = 1024 if op_itemsize <= 2 else 512
    elif gen == "v7x":
        mn_target = 1536 if op_itemsize <= 2 else 768
    else:
        if vmem_cap >= (100 << 20):
            mn_target = 1536 if op_itemsize <= 2 else 1024
        else:
            mn_target = 1024 if op_itemsize <= 2 else 768
    m_target = tile_m if tile_m is not None else mn_target
    n_target = tile_n if tile_n is not None else mn_target
    k_target = tile_k if tile_k is not None else 512

    tm = _pick_tile(B, m_target, 8)
    tn = _pick_tile(N, n_target, 128)
    tk = _pick_tile(K, k_target, 128)

    # v7x has 2 TensorCores: make sure the "parallel" (m, n) axes have at
    # least 2 blocks so both cores get work (decode / small-batch shapes).
    if gen in ("v7x", "unknown"):
        np_aligned = _round_up(N, 128)
        grid_mn = (_round_up(B, tm) // tm) * (_round_up(N, tn) // tn)
        if grid_mn < 2 and np_aligned >= 256:
            tn = _pick_tile(N, max(128, ((np_aligned // 2) // 128) * 128), 128)

    xb = jnp.dtype(x2d.dtype).itemsize
    wb = jnp.dtype(weight.dtype).itemsize
    ob = jnp.dtype(out_dtype).itemsize
    f32_out = jnp.dtype(out_dtype) == jnp.dtype(jnp.float32)

    # VMEM budget: never exceed the physical per-core VMEM (64 MiB on v7x,
    # 128 MiB on v5e/v6e); leave headroom for Mosaic's own scratch.
    budget = min(int(vmem_cap * 0.9), vmem_cap - (4 << 20))
    fit_budget = int(budget * 0.8)

    def _vmem_need(tm_, tn_, tk_):
        # double-buffered x / w / out blocks + bias (+ optional f32 acc)
        need = 2 * (tm_ * tk_ * xb + tn_ * tk_ * wb + tm_ * tn_ * ob + tn_ * 4)
        if not f32_out:
            need += tm_ * tn_ * 4
        return need

    # Shrink (tn, tm, tk round-robin) in the unlikely case the chosen (or
    # user-supplied) tiles exceed the per-core VMEM budget.
    turn = 0
    while _vmem_need(tm, tn, tk) > fit_budget and (tm > 8 or tn > 128 or tk > 128):
        if turn == 0 and tn > 128:
            tn = max(128, (tn // 2) // 128 * 128)
        elif turn == 1 and tm > 8:
            tm = max(8, (tm // 2) // 8 * 8)
        elif tk > 128:
            tk = max(128, (tk // 2) // 128 * 128)
        turn = (turn + 1) % 3

    Bp = _round_up(B, tm)
    Np = _round_up(N, tn)
    Kp = _round_up(K, tk)

    # Zero-pad to tile multiples (zeros contribute nothing to the K reduction;
    # padded N columns / B rows are sliced away afterwards). With divisor
    # tiles this is a no-op for already-aligned shapes.
    xp = x2d if (Bp, Kp) == (B, K) else jnp.pad(x2d, ((0, Bp - B), (0, Kp - K)))
    wp = weight if (Np, Kp) == (N, K) else jnp.pad(weight, ((0, Np - N), (0, Kp - K)))
    if bias is None:
        bp = jnp.zeros((1, Np), dtype=jnp.float32)
    else:
        bp = jnp.pad(bias.astype(jnp.float32), (0, Np - N)).reshape(1, Np)

    grid = (Bp // tm, Np // tn, Kp // tk)

    kernel = _tiled_linear_kernel_f32 if f32_out else _tiled_linear_kernel_acc
    scratch_shapes = [] if f32_out else [pltpu.VMEM((tm, tn), jnp.float32)]

    vmem_need = _vmem_need(tm, tn, tk)
    vmem_limit = int(min(max(int(vmem_need * 1.5), 32 << 20), budget))

    cost = pl.CostEstimate(
        flops=2 * Bp * Np * Kp,
        transcendentals=0,
        bytes_accessed=int(Bp * Kp * xb + Np * Kp * wb + Bp * Np * ob + Np * 4),
    )

    out2d = pl.pallas_call(
        kernel,
        out_shape=jax.ShapeDtypeStruct((Bp, Np), out_dtype),
        grid_spec=pltpu.PrefetchScalarGridSpec(
            num_scalar_prefetch=0,
            grid=grid,
            in_specs=[
                # x tile: batch block m, K block k
                pl.BlockSpec((tm, tk), lambda m, n, k: (m, k)),
                # weight tile in native (out, in) layout: N block n, K block k
                pl.BlockSpec((tn, tk), lambda m, n, k: (n, k)),
                # bias tile: only depends on the output-column block
                pl.BlockSpec((1, tn), lambda m, n, k: (0, n)),
            ],
            out_specs=pl.BlockSpec((tm, tn), lambda m, n, k: (m, n)),
            scratch_shapes=scratch_shapes,
        ),
        compiler_params=pltpu.CompilerParams(
            dimension_semantics=("parallel", "parallel", "arbitrary"),
            vmem_limit_bytes=vmem_limit,
        ),
        cost_estimate=cost,
    )(xp, wp, bp)

    out = out2d[:B, :N].reshape(*lead, N)

    if combine_out_splits:
        return out
    # combine_out_splits=False: return the per-out-split chunks, matching the
    # PyTorch module's uncombined output list.
    out_parts = _partition_uniform(out_features, out_splits)
    return [out[..., out_parts[i]:out_parts[i + 1]] for i in range(out_splits)]


if __name__ == "__main__":
    key = jax.random.PRNGKey(0)
    k_x, k_w, k_b = jax.random.split(key, 3)

    batch, seq = 2, 4
    in_features, out_features = 256, 256
    in_splits, out_splits = 2, 2

    x = jax.random.normal(k_x, (batch, seq, in_features), dtype=jnp.float32)
    # deterministic "Linear" parameters (synthetic init, not a checkpoint)
    weight = jax.random.normal(k_w, (out_features, in_features), dtype=jnp.float32) * 0.02
    bias = jax.random.normal(k_b, (out_features,), dtype=jnp.float32) * 0.02

    y = tiled_linear(x, weight, bias, in_splits=in_splits, out_splits=out_splits)
    y = jax.block_until_ready(y)

    # reference: plain linear (TiledLinear with combine_out_splits=True is identical)
    y_ref = x @ weight.T + bias
    assert y.shape == (batch, seq, out_features)
    assert jnp.allclose(y, y_ref, atol=1e-4, rtol=1e-4)

    print("KERNEL_OK")
</pallas_src>

<mosaic_0001>
module attributes {stable_mosaic.version = 11 : i64} {
  func.func @_tiled_linear_kernel_f32(%arg0: i32, %arg1: i32, %arg2: i32, %arg3: memref<8x256xf32, #tpu.memory_space<vmem>>, %arg4: memref<128x256xf32, #tpu.memory_space<vmem>>, %arg5: memref<1x128xf32, #tpu.memory_space<vmem>>, %arg6: memref<8x128xf32, #tpu.memory_space<vmem>>) attributes {dimension_semantics = [#tpu.dimension_semantics<parallel>, #tpu.dimension_semantics<parallel>, #tpu.dimension_semantics<arbitrary>], iteration_bounds = array<i64: 1, 2, 1>, scalar_prefetch = 0 : i64, scratch_operands = 0 : i64, tpu.core_type = #tpu.core_type<tc>, window_params = [{transform_indices = @transform_0, window_bounds = array<i64: 8, 256>}, {transform_indices = @transform_1, window_bounds = array<i64: 128, 256>}, {transform_indices = @transform_2, window_bounds = array<i64: 1, 128>}, {transform_indices = @transform_3, window_bounds = array<i64: 8, 128>}]} {
    %c0_i32 = arith.constant 0 : i32
    %0 = arith.cmpi eq, %arg2, %c0_i32 : i32
    %1 = arith.extui %0 : i1 to i32
    %c0_i32_0 = arith.constant 0 : i32
    %2 = arith.cmpi ne, %1, %c0_i32_0 : i32
    scf.if %2 {
      %cst_10 = arith.constant 0.000000e+00 : f32
      %12 = vector.broadcast %cst_10 : f32 to vector<8x128xf32>
      %c0_11 = arith.constant 0 : index
      %c0_12 = arith.constant 0 : index
      %13 = vector.load %arg6[%c0_11, %c0_12] : memref<8x128xf32, #tpu.memory_space<vmem>>, vector<8x128xf32>
      tpu.vector_store %arg6[%c0_11, %c0_12], %12 {strides = array<i32>} : memref<8x128xf32, #tpu.memory_space<vmem>>, vector<8x128xf32>,
    } else {
    }
    %c0 = arith.constant 0 : index
    %c0_1 = arith.constant 0 : index
    %3 = vector.load %arg6[%c0, %c0_1] : memref<8x128xf32, #tpu.memory_space<vmem>>, vector<8x128xf32>
    %c0_2 = arith.constant 0 : index
    %c0_3 = arith.constant 0 : index
    %4 = vector.load %arg3[%c0_2, %c0_3] : memref<8x256xf32, #tpu.memory_space<vmem>>, vector<8x256xf32>
    %c0_4 = arith.constant 0 : index
    %c0_5 = arith.constant 0 : index
    %5 = vector.load %arg4[%c0_4, %c0_5] : memref<128x256xf32, #tpu.memory_space<vmem>>, vector<128x256xf32>
    %cst = arith.constant dense<0.000000e+00> : vector<8x128xf32>
    %6 = tpu.matmul %4, %5, %cst {dimension_numbers = #tpu.dot_dimension_numbers<[1], [1], [0], [0], [0, 0, 1, 0], [], []>} : vector<8x256xf32>, vector<128x256xf32>, vector<8x128xf32> -> vector<8x128xf32>
    %7 = arith.addf %3, %6 : vector<8x128xf32>
    %c0_6 = arith.constant 0 : index
    %c0_7 = arith.constant 0 : index
    %8 = vector.load %arg6[%c0_6, %c0_7] : memref<8x128xf32, #tpu.memory_space<vmem>>, vector<8x128xf32>
    tpu.vector_store %arg6[%c0_6, %c0_7], %7 {strides = array<i32>} : memref<8x128xf32, #tpu.memory_space<vmem>>, vector<8x128xf32>,
    %c0_i32_8 = arith.constant 0 : i32
    %9 = arith.cmpi eq, %arg2, %c0_i32_8 : i32
    %10 = arith.extui %9 : i1 to i32
    %c0_i32_9 = arith.constant 0 : i32
    %11 = arith.cmpi ne, %10, %c0_i32_9 : i32
    scf.if %11 {
      %c0_10 = arith.constant 0 : index
      %c0_11 = arith.constant 0 : index
      %12 = vector.load %arg6[%c0_10, %c0_11] : memref<8x128xf32, #tpu.memory_space<vmem>>, vector<8x128xf32>
      %c0_12 = arith.constant 0 : index
      %c0_13 = arith.constant 0 : index
      %13 = vector.load %arg5[%c0_12, %c0_13] : memref<1x128xf32, #tpu.memory_space<vmem>>, vector<1x128xf32>
      %14 = vector.broadcast %13 : vector<1x128xf32> to vector<8x128xf32>
      %15 = arith.addf %12, %14 : vector<8x128xf32>
      %c0_14 = arith.constant 0 : index
      %c0_15 = arith.constant 0 : index
      %16 = vector.load %arg6[%c0_14, %c0_15] : memref<8x128xf32, #tpu.memory_space<vmem>>, vector<8x128xf32>
      tpu.vector_store %arg6[%c0_14, %c0_15], %15 {strides = array<i32>} : memref<8x128xf32, #tpu.memory_space<vmem>>, vector<8x128xf32>,
    } else {
    }
    return
  }
  func.func @transform_0(%arg0: i32, %arg1: i32, %arg2: i32) -> (i32, i32) {
    %c0_i32 = arith.constant 0 : i32
    return %arg0, %arg2 : i32, i32
  }
  func.func @transform_1(%arg0: i32, %arg1: i32, %arg2: i32) -> (i32, i32) {
    %c0_i32 = arith.constant 0 : i32
    return %arg1, %arg2 : i32, i32
  }
  func.func @transform_2(%arg0: i32, %arg1: i32, %arg2: i32) -> (i32, i32) {
    %c0_i32 = arith.constant 0 : i32
    %c0_i32_0 = arith.constant 0 : i32
    return %c0_i32, %arg1 : i32, i32
  }
  func.func @transform_3(%arg0: i32, %arg1: i32, %arg2: i32) -> (i32, i32) {
    %c0_i32 = arith.constant 0 : i32
    return %arg0, %arg1 : i32, i32
  }
}

</mosaic_0001>

<bundles_post_ra>
// kernel: tpu_custom_call.1
= control target key start
LH: loop header
LB: loop body
LE: loop exit
PB: predicated region body
PF: predicated region fallthrough
CT: control target
= control target key end

     0   :  { %8 = vsyncpa [#allocation3], 0  ;;  %s1068_s0 = inlined_call_operand.hbm [shape: f32[8,256], index: 0, kind: input, shape index: {}]   ;;  %s1069_s1 = inlined_call_operand.hbm [shape: f32[256,256], index: 1, kind: input, shape index: {}]   ;;  %s1070_s2 = inlined_call_operand.vmem [shape: f32[1,256], index: 2, kind: input, shape index: {}]   ;;  %s1071_s3 = inlined_call_operand.hbm [shape: f32[8,256], index: 3, kind: output, shape index: {}]  }
   0x1   :  { %9 = vsyncpa [#allocation6], 0 }
   0x2   :  { %11 = vsyncpa [#allocation6 + $0x1], 0 }
   0x3   :  { %12 = vsyncpa [#allocation4], 0 }
   0x4   :  { %14 = vsyncpa [#allocation4 + $0x1], 0  ;;  %s809_s12 = smov 0   ;;  %s811_s13 = smov 0  }
   0x5   :  { %s813_s14 = smov 0   ;;  %s815_s15 = smov 0  }
   0x6   :  { %s817_s16 = smov 0   ;;  %s819_s17 = smov 0  }
   0x7 LB: > { %s510_s18 = sadd.s32 4294967295, %s782_s17   ;;  %s511_s19 = sadd.s32 4294967294, %s782_s17   ;;  %s782_s17 = sphi %s819_s17, %s20_s17   ;;  %s778_s16 = sphi %s817_s16, %s1099_s16   ;;  %s774_s15 = sphi %s815_s15, %s1098_s15   ;;  %s770_s14 = sphi %s813_s14, %s1097_s14   ;;  %s766_s13 = sphi %s811_s13, %s1096_s13   ;;  %s762_s12 = sphi %s809_s12, %s1095_s12  }
   0x8   : > { %s76_s20 = sadd.s32 1, %s770_s14  ;;  %p83_p0 = scmp.ne.s32.totalorder %s770_s14, %s766_s13 }
   0x9   : > { %p84_p1 = scmp.eq.s32.totalorder %s782_s17, 0  ;;  %p89_p2 = scmp.ne.s32.totalorder %s766_s13, %s762_s12 }
   0xa   : > { %p847_p3 = scmp.eq.s32.totalorder %s510_s18, 0  ;;  %p141_p4 = scmp.eq.s32.totalorder %s510_s18, 1 }
   0xb   : > { %p851_p5 = por %p84_p1, %p83_p0  ;;  %p147_p6 = scmp.eq.s32.totalorder %s511_s19, 1 }
   0xc   : > { %s1078_s21 = scalar_select %p847_p3, 1, 0 }
   0xd   : > { %p857_p7 = por %p847_p3, %p89_p2  ;;  %p861_p8 = por %p141_p4, %p83_p0 }
   0xe   : > { %p865_p9 = por %p147_p6, %p89_p2  ;;  %p512_p10 = scmp.ge.s32.totalorder %s782_s17, 1 }
   0xf   : > { %s1080_s23 = scalar_select %p857_p7, 1, 0 }
  0x10   : > { %s1081_s24 = scalar_select %p861_p8, 1, 0 }
  0x11   : > { %s1082_s25 = scalar_select %p865_p9, 1, 0 }
  0x12   : > { %p154_p11 = scmp.lt.s32.totalorder %s782_s17, 3  ;;  %s784_s27 = smov [#allocation2]  }
  0x13   : > { %s172_s28 = sshll.u32 %s784_s27, 4  ;;  %p583_p1 = scmp.lt.s32.totalorder %s782_s17, 2  ;;  %s173_s28 = int_to_ptr.vmem [resolvable:$true] %s172_s28 }
  0x14   : > { %p872_p13 = pnand %p512_p10, %p154_p11  ;;  %s35_s4 = sadd.s32 1, %s778_s16 }
  0x15   : > { %p881_p4 = pnand %p583_p1, %p851_p5  ;;  %p892_p6 = scmp.ge.s32.totalorder %s35_s4, 2 }
  0x16   : > { %s1083_s26 = scalar_select %p872_p13, 1, 0 }
  0x17   : > { %p570_p0 = pneg %p872_p13  ;;  %s183_s6 = sand.u32 1, %s770_s14  }
  0x18   : > { %s1084_s29 = scalar_select %p881_p4, 1, 0 }
  0x19   : > { %p887_p2 = pnand %p570_p0, %p847_p3  ;;  %s638_s9 = scalar_lea.hbm %s1068_s0, 256 }
  0x1a   : > { %s1086_s5 = scalar_select %p892_p6, 1, 0 }
  0x1b   : > { %p639_p5 = scmp.ne.s32.totalorder %s1068_s0, %s638_s9  ;;  %p640_p10 = pneg %p887_p2 }
  0x1c   : > { %p645_p0 = scmp.lt.u32.totalorder %s638_s9, %s1068_s0 }
  0x1d   : > { %p641_p11 = pnand %p640_p10, %p639_p5 }
  0x1f   : > { %p642_p1 = pneg %p641_p11 }
  0x21   : > { %p647_p12 = pnand %p645_p0, %p642_p1 }
  0x23   : > { %650 = shalt.err (!%p647_p12)
}
  0x24   : > { %s651_s22 = scalar_lea.vmem %s173_s28, 256  ;;  %p659_p3 = scmp.lt.s32.totalorder %s173_s28, %s173_s28 }
  0x25   : > { %p652_p9 = scmp.ne.s32.totalorder %s173_s28, %s651_s22  ;;  %p660_p13 = scmp.lt.s32.totalorder %s651_s22, %s651_s22 }
  0x27   : > { %p654_p8 = pnand %p652_p9, %p640_p10  ;;  %p661_p4 = por %p660_p13, %p659_p3 }
  0x29   : > { %p655_p7 = pneg %p654_p8 }
  0x2b   : > { %p662_p6 = pnand %p661_p4, %p655_p7 }
  0x2d   : > { %665 = shalt.err (!%p662_p6)
}
  0x2e   : > { %573 = dma.hbm_to_vmem [thread:$0]  (!%p887_p2), %s1068_s0, 256, %s173_s28, [#allocation3]  }
  0x2f   : > { %p1087_p9 = scmp.ne.s32.totalorder %s1086_s5, 0  ;;  %s515_s8 = sshll.u32 %s183_s6, 8 }
  0x30   : > { %s529_s10 = sshll.u32 %s778_s16, 12  ;;  %s187_s19 = scalar_lea.vmem [#allocation5], %s515_s8 }
  0x31   : > { %s1101_s4 = smov (%p1087_p9, %s35_s4), 0  ;;  %s923_s18 = scalar_lea.hbm %s1069_s1, %s529_s10 }
  0x32   : > { %s71_s9 = ssub.s32 %s778_s16, %s1101_s4  ;;  %s197_s22 = sshll.u32 %s187_s19, 4  ;;  %s930_s22 = int_to_ptr.vmem [resolvable:$true] %s197_s22 }
  0x33   : > { %p74_p3 = scmp.eq.s32.totalorder %s71_s9, 0  ;;  %s932_s5 = scalar_lea.sflag [#allocation6], %s183_s6 }
  0x34   : > { %s666_s27 = scalar_lea.hbm %s923_s18, 4096  ;;  %p1088_p8 = scmp.ne.s32.totalorder %s1084_s29, 0 }
  0x35   : > { %s928_s28 = scalar_select %p74_p3, %s770_s14, %s76_s20  }
  0x36   : > { %p667_p7 = scmp.ne.s32.totalorder %s923_s18, %s666_s27  ;;  %p668_p12 = pneg %p1088_p8 }
  0x37   : > { %s671_s8 = scalar_lea.hbm %s1069_s1, 8192  ;;  %p672_p2 = scmp.lt.u32.totalorder %s923_s18, %s1069_s1 }
  0x38   : > { %p669_p13 = pnand %p668_p12, %p667_p7  ;;  %p673_p6 = scmp.lt.u32.totalorder %s671_s8, %s666_s27 }
  0x39   : > { %p675_p10 = scmp.lt.u32.totalorder %s666_s27, %s923_s18 }
  0x3a   : > { %p670_p4 = pneg %p669_p13  ;;  %p674_p5 = por %p673_p6, %p672_p2 }
  0x3c   : > { %p676_p11 = por %p675_p10, %p674_p5 }
  0x3e   : > { %p677_p1 = pnand %p676_p11, %p670_p4 }
  0x40   : > { %680 = shalt.err (!%p677_p1)
}
  0x41   : > { %s681_s20 = scalar_lea.vmem %s930_s22, 4096  ;;  %s785_s6 = smov [#allocation5]  }
  0x42   : > { %p682_p0 = scmp.ne.s32.totalorder %s930_s22, %s681_s20  ;;  %s686_s11 = sshll.u32 %s785_s6, 4  ;;  %s687_s11 = int_to_ptr.vmem [resolvable:$false] %s686_s11 }
  0x43   : > { %s688_s19 = scalar_lea.vmem %s687_s11, 8192  ;;  %p689_p7 = scmp.lt.s32.totalorder %s930_s22, %s687_s11 }
  0x44   : > { %p684_p9 = pnand %p682_p0, %p668_p12  ;;  %p690_p13 = scmp.lt.s32.totalorder %s688_s19, %s681_s20 }
  0x46   : > { %p685_p3 = pneg %p684_p9  ;;  %p691_p2 = por %p690_p13, %p689_p7 }
  0x48   : > { %p692_p6 = pnand %p691_p2, %p685_p3 }
  0x4a   : > { %695 = shalt.err (!%p692_p6)
}
  0x4b   : > { %s786_s27 = smov 256   ;;  %s787_s7 = smov 16  }
  0x4c   : > { %577 = dma.hbm_to_vmem [thread:$0]  (!%p1088_p8), %s923_s18, 4096, %s930_s22, %s932_s5, %s786_s27, %s786_s27, %s787_s7  }
  0x4d   : > { %p1089_p12 = scmp.ne.s32.totalorder %s1083_s26, 0 }
  0x4e   : > { %p1090_p4 = scmp.ne.s32.totalorder (!%p1089_p12), %s1078_s21, 0 }
  0x4f   : > { %215 = sbr.rel (%p1089_p12) target bundleno = 386 (0x182), region = 32 }
  0x56   : > { %749 = dma.done.wait (%p1090_p4), [#allocation3], 256  }
  0x57   : > { %751 = vsyncadd (%p1090_p4), [#allocation3], 4294967040  ;;  %s967_s9 = sand.u32 1, %s766_s13   ;;  %p1091_p8 = scmp.ne.s32.totalorder %s1080_s23, 0 }
  0x58   : > { %s521_s8 = sshll.u32 %s967_s9, 8  ;;  %s222_s10 = scalar_lea.sflag [#allocation6], %s967_s9 }
  0x59   : > { %s971_s30 = scalar_lea.vmem [#allocation5], %s521_s8 }
  0x5a   : > { %753 = dma.done.wait (%p1091_p8), %s222_s10, 4096  }
  0x5b   : > { %755 = vsyncadd (%p1091_p8), %s222_s10, 4294963200  ;;  %v266_v0 = vld [vmem:[%s971_s30 + $0x8] sm:$0xff]  ;;  %v268_v1 = vld [vmem:[%s971_s30 + $0x18] sm:$0xff]  ;;  %p254_p5 = scmp.lt.s32.totalorder %s774_s15, 1  ;;  %s522_s23 = sshll.u32 %s967_s9, 3 }
  0x5c   : > { %v265_v2 = vld [vmem:[%s971_s30] sm:$0xff]  ;;  %v530_v3 = vpack.c.bf16 %v268_v1, %v266_v0  ;;  %v267_v4 = vld [vmem:[%s971_s30 + $0x10] sm:$0xff]  ;;  %v270_v5 = vld [vmem:[%s971_s30 + $0x28] sm:$0xff]  ;;  %s525_s22 = sshll.u32 %s774_s15, 7  ;;  %s250_s5 = scalar_lea.vmem [#allocation7], %s522_s23 }
  0x5d   : > { %v272_v6 = vld [vmem:[%s971_s30 + $0x38] sm:$0xff]  ;;  %v532_v7 = vpack.c.bf16 %v267_v4, %v265_v2  ;;  %v269_v9 = vld [vmem:[%s971_s30 + $0x20] sm:$0xff]  ;;  %v271_v10 = vld [vmem:[%s971_s30 + $0x30] sm:$0xff]  ;;  %s255_s21 = scalar_select %p254_p5, %s774_s15, 1 }
  0x5e   : > { %v534_v8 = vpack.c.bf16 %v272_v6, %v270_v5  ;;  %531 = vmatprep.subr.bf16.mxu0 %v530_v3  ;;  %v274_v11 = vld [vmem:[%s971_s30 + $0x48] sm:$0xff]  ;;  %v276_v12 = vld [vmem:[%s971_s30 + $0x58] sm:$0xff]  ;;  %v536_v13 = vpack.c.bf16 %v271_v10, %v269_v9  ;;  %v273_v16 = vld [vmem:[%s971_s30 + $0x40] sm:$0xff]  ;;  %s398_s20 = sshll.u32 %s250_s5, 4  ;;  %s1019_s19 = scalar_lea.hbm %s1071_s3, %s525_s22  ;;  %s1021_s20 = int_to_ptr.vmem [resolvable:$true] %s398_s20 }
  0x5f   : > { %533 = vmatpush1.bf16.xpose.msra.mxu0 %v532_v7  ;;  %v538_v14 = vpack.c.bf16 %v276_v12, %v274_v11  ;;  %v264_v15 = vld [vmem:[#allocation2 + $0x8] sm:$0xff]  ;;  %v275_v17 = vld [vmem:[%s971_s30 + $0x50] sm:$0xff]  ;;  %v278_v18 = vld [vmem:[%s971_s30 + $0x68] sm:$0xff]  ;;  %s256_s18 = scalar_lea.vmem %s1070_s2, %s255_s21  ;;  %s383_s27 = scalar_lea.sflag [#allocation4], %s967_s9 }
  0x60   : > { %535 = vmatprep.subr.bf16.mxu0 %v534_v8  ;;  %361 = vmatprep.mubr.f32.mxu0 %v264_v15  ;;  %v280_v19 = vld [vmem:[%s971_s30 + $0x78] sm:$0xff]  ;;  %v540_v20 = vpack.c.bf16 %v275_v17, %v273_v16  ;;  %v277_v22 = vld [vmem:[%s971_s30 + $0x60] sm:$0xff]  ;;  %v279_v23 = vld [vmem:[%s971_s30 + $0x70] sm:$0xff]  ;;  %s696_s7 = scalar_lea.vmem %s1021_s20, 128  ;;  %p1092_p11 = scmp.ne.s32.totalorder %s1081_s24, 0 }
  0x61   : > { %v542_v21 = vpack.c.bf16 %v280_v19, %v278_v18  ;;  %v282_v24 = vld [vmem:[%s971_s30 + $0x88] sm:$0xff]  ;;  %v284_v25 = vld [vmem:[%s971_s30 + $0x98] sm:$0xff]  ;;  %v544_v26 = vpack.c.bf16 %v279_v23, %v277_v22  ;;  %v281_v28 = vld [vmem:[%s971_s30 + $0x80] sm:$0xff]  ;;  %p697_p10 = scmp.ne.s32.totalorder %s1021_s20, %s696_s7  ;;  %s788_s15 = smov [#allocation7]  }
  0x62   : > { %v546_v27 = vpack.c.bf16 %v284_v25, %v282_v24  ;;  %v283_v29 = vld [vmem:[%s971_s30 + $0x90] sm:$0xff]  ;;  %v286_v30 = vld [vmem:[%s971_s30 + $0xa8] sm:$0xff]  ;;  %v288_v31 = vld [vmem:[%s971_s30 + $0xb8] sm:$0xff]  ;;  %s700_s8 = sshll.u32 %s788_s15, 4  ;;  %s701_s8 = int_to_ptr.vmem [resolvable:$false] %s700_s8 }
  0x63   : > { %v548_v32 = vpack.c.bf16 %v283_v29, %v281_v28  ;;  %v550_v33 = vpack.c.bf16 %v288_v31, %v286_v30  ;;  %v285_v34 = vld [vmem:[%s971_s30 + $0xa0] sm:$0xff]  ;;  %v287_v35 = vld [vmem:[%s971_s30 + $0xb0] sm:$0xff]  ;;  %v290_v36 = vld [vmem:[%s971_s30 + $0xc8] sm:$0xff]  ;;  %p698_p1 = pnand %p697_p10, %p1092_p11  ;;  %s702_s10 = scalar_lea.vmem %s701_s8, 256 }
  0x64   : > { %v292_v37 = vld [vmem:[%s971_s30 + $0xd8] sm:$0xff]  ;;  %v552_v38 = vpack.c.bf16 %v287_v35, %v285_v34  ;;  %v289_v40 = vld [vmem:[%s971_s30 + $0xc0] sm:$0xff]  ;;  %v291_v41 = vld [vmem:[%s971_s30 + $0xd0] sm:$0xff]  ;;  %p703_p9 = scmp.lt.s32.totalorder %s1021_s20, %s701_s8  ;;  %p704_p3 = scmp.lt.s32.totalorder %s702_s10, %s696_s7 }
  0x65   : > { %v554_v39 = vpack.c.bf16 %v292_v37, %v290_v36  ;;  %v294_v42 = vld [vmem:[%s971_s30 + $0xe8] sm:$0xff]  ;;  %v296_v43 = vld [vmem:[%s971_s30 + $0xf8] sm:$0xff]  ;;  %v556_v44 = vpack.c.bf16 %v291_v41, %v289_v40  ;;  %v293_v46 = vld [vmem:[%s971_s30 + $0xe0] sm:$0xff]  ;;  %p699_p0 = pneg %p698_p1 }
  0x66   : > { %v558_v45 = vpack.c.bf16 %v296_v43, %v294_v42  ;;  %v295_v47 = vld [vmem:[%s971_s30 + $0xf0] sm:$0xff]  ;;  %p705_p7 = por %p704_p3, %p703_p9 }
  0x67   : > { %537 = vmatpush1.bf16.xpose.msra.mxu0 %v536_v13  ;;  %v560_v48 = vpack.c.bf16 %v295_v47, %v293_v46  ;;  %v263_v49 = vld [vmem:[#allocation2] sm:$0xff] }
  0x68   : > { %539 = vmatprep.subr.bf16.mxu0 %v538_v14  ;;  %v523_v51 = vld [vmem:[%s256_s18] ss:$0 sm:$0xff]  ;;  %p706_p13 = pnand %p705_p7, %p699_p0 }
  0x6f   : > { %541 = vmatpush1.bf16.xpose.msra.mxu0 %v540_v20 }
  0x70   : > { %543 = vmatprep.subr.bf16.mxu0 %v542_v21 }
  0x77   : > { %545 = vmatpush1.bf16.xpose.msra.mxu0 %v544_v26 }
  0x78   : > { %547 = vmatprep.subr.bf16.mxu0 %v546_v27 }
  0x7f   : > { %549 = vmatpush1.bf16.xpose.msra.mxu0 %v548_v32 }
  0x80   : > { %551 = vmatprep.subr.bf16.mxu0 %v550_v33 }
  0x87   : > { %553 = vmatpush1.bf16.xpose.msra.mxu0 %v552_v38 }
  0x88   : > { %555 = vmatprep.subr.bf16.mxu0 %v554_v39 }
  0x8f   : > { %557 = vmatpush1.bf16.xpose.msra.mxu0 %v556_v44 }
  0x90   : > { %559 = vmatprep.subr.bf16.mxu0 %v558_v45 }
  0x97   : > { %561 = vmatpush1.bf16.xpose.msra.mxu0 %v560_v48 }
  0x9e   : > { %362 = vmatmul.mubr.f32.vlgmr.msra.gmra.mrb[0].mxu0 %v263_v49 }
 0x171   : > { %v363_v50 = vpop.f32.mrb[0].mxu0 }
 0x172   : > { %v365_v52 = vpop.f32.mrb[1].mxu0  ;;  %v380_v53 = vadd.f32 %v523_v51, %v363_v50 }
 0x174   : > { %381 = vst [vmem:[%s250_s5] sm:$0xff] %v380_v53 }
 0x175   : > { %709 = shalt.err (!%p706_p13)
}
 0x176   : > { %s710_s9 = scalar_lea.hbm %s1019_s19, 128  ;;  %s714_s23 = scalar_lea.hbm %s1071_s3, 256 }
 0x177   : > { %p711_p2 = scmp.ne.s32.totalorder %s1019_s19, %s710_s9  ;;  %p715_p4 = scmp.lt.u32.totalorder %s1019_s19, %s1071_s3 }
 0x178   : > { %p716_p8 = scmp.lt.u32.totalorder %s714_s23, %s710_s9  ;;  %p718_p10 = scmp.lt.u32.totalorder %s710_s9, %s1019_s19 }
 0x179   : > { %p712_p6 = pnand %p711_p2, %p1092_p11 }
 0x17a   : > { %p717_p5 = por %p716_p8, %p715_p4 }
 0x17b   : > { %p713_p12 = pneg %p712_p6 }
 0x17c   : > { %p719_p1 = por %p718_p10, %p717_p5 }
 0x17e   : > { %p720_p0 = pnand %p719_p1, %p713_p12 }
 0x180   : > { %723 = shalt.err (!%p720_p0)
}
 0x181   : > { %568 = dma.vmem_to_hbm [thread:$0]  (%p1092_p11), %s1021_s20, 128, %s1019_s19, %s383_s27  }
 0x182 PF: > { %s410_s18 = sand.u32 1, %s762_s12   ;;  %p1093_p9 = scmp.ne.s32.totalorder %s1082_s25, 0 }
 0x183   : > { %p1094_p3 = scmp.ge.s32.totalorder %s782_s17, 2  ;;  %s411_s22 = scalar_lea.sflag [#allocation4], %s410_s18 }
 0x185   : > { %p579_p7 = pnand %p1094_p3, %p1093_p9 }
 0x187   : > { %757 = dma.done.wait (!%p579_p7), %s411_s22, 128  }
 0x188   : > { %759 = vsyncadd (!%p579_p7), %s411_s22, 4294967168  ;;  %s20_s17 = sadd.s32 1, %s782_s17   ;;  %s1095_s12 = smov %s766_s13 }
 0x189   : > { %p17_p13 = scmp.ge.s32.totalorder %s20_s17, 4   ;;  %s1096_s13 = smov %s770_s14 }
 0x18a   : > { %s1097_s14 = smov %s928_s28  ;;  %s1098_s15 = smov %s778_s16 }
 0x18b   : > { %s1099_s16 = smov %s1101_s4  ;;  %19 = sbr.rel (!%p17_p13) target bundleno = 7 (0x7), region = 94 }
 0x192   :  { %416 = vsyncpa [#allocation3], 1 }
 0x193   :  { %418 = vsyncpa [#allocation3 + $0x1], 1 }
 0x194   :  { %419 = vsyncpa [#allocation6], 1 }
 0x195   :  { %421 = vsyncpa [#allocation6 + $0x1], 1 }
 0x196   :  { %422 = vsyncpa [#allocation4], 1 }
 0x197   :  { %424 = vsyncpa [#allocation4 + $0x1], 1 }

</bundles_post_ra>
